<compile_context>
chip_gen: v6e
topology: v6e:2x2x1
jax: 0.10.0
libtpu: 0.0.40
codegen_flags: <defaults>
</compile_context>

<pallas_src>
import functools

import jax
import jax.numpy as jnp
from jax.experimental import pallas as pl
from jax.experimental.pallas import tpu as pltpu

BN_EPS = 1e-5
MXU_DTYPE = jnp.bfloat16   # MXU operand / inter-kernel activation dtype.


def _conv3x3_reflect_im2col(x, w_mat, hi, wi, *, H, W):
    """3x3 reflection-padded 'same' convolution as a single MXU matmul.

    x:     (C_in, H*W) float32, lane-dense (spatial on lanes).
    w_mat: (C_out, 9*C_in) bf16, tap-major layout ((kh*3+kw)*C_in + c_in).
    hi/wi: (1, H*W) float32 row / column index of each flattened position.
    returns (C_out, H*W) float32 (f32 MXU accumulation), no bias.
    """
    HW = H * W

    def shift(s):
        # out[:, p] = x[:, (p + s) % HW]; wrapped entries are fixed by the
        # reflection masks below.  pltpu.roll == jnp.roll => shift = (-s) % HW.
        if s % HW == 0:
            return x
        return pltpu.roll(x, (-s) % HW, axis=1)

    shifted = {(dh, dw): shift(dh * W + dw)
               for dh in (-1, 0, 1) for dw in (-1, 0, 1)}

    # Reflection boundary masks (grid-invariant; indices hoisted to the wrapper).
    row_edge = {-1: hi == 0.0, 0: None, 1: hi == float(H - 1)}
    col_edge = {-1: wi == 0.0, 0: None, 1: wi == float(W - 1)}

    taps = []
    for dh in (-1, 0, 1):            # kh = dh + 1
        for dw in (-1, 0, 1):        # kw = dw + 1
            rm, cm = row_edge[dh], col_edge[dw]
            # Reflection: at an edge the tap reads the mirrored offset (-dh/-dw).
            a = shifted[(dh, dw)]
            if cm is not None:
                a = jnp.where(cm, shifted[(dh, -dw)], a)
            if rm is not None:
                b = shifted[(-dh, dw)]
                if cm is not None:
                    b = jnp.where(cm, shifted[(-dh, -dw)], b)
                a = jnp.where(rm, b, a)
            taps.append(a.astype(MXU_DTYPE))          # cast per-tap: bf16 concat

    patches = jnp.concatenate(taps, axis=0)           # (9*C_in, HW) bf16
    return jnp.dot(w_mat, patches, preferred_element_type=jnp.float32)


def _store_partial_stats(y_f32, stats_ref):
    """Per-grid-step partial (sum, sumsq) over the spatial axis -> (C, 2)."""
    s = jnp.sum(y_f32, axis=1, keepdims=True)
    q = jnp.sum(y_f32 * y_f32, axis=1, keepdims=True)
    stats_ref[...] = jnp.concatenate([s, q], axis=1)


def _conv1_kernel(x_ref, w_ref, hi_ref, wi_ref, y_ref, stats_ref, *, H, W):
    """conv1 (no bias) over one image + per-image partial BN1 statistics."""
    y = _conv3x3_reflect_im2col(x_ref[...], w_ref[...], hi_ref[...], wi_ref[...],
                                H=H, W=W)
    y_ref[...] = y.astype(y_ref.dtype)          # bf16 storage
    _store_partial_stats(y, stats_ref)          # stats from pre-cast f32 value


def _conv2_kernel(y1_ref, s1_ref, t1_ref, w_ref, hi_ref, wi_ref,
                  y2_ref, stats_ref, *, H, W):
    """BN1 (precomputed scale/shift) + ReLU + conv2 + partial BN2 statistics."""
    z = jnp.maximum(y1_ref[...].astype(jnp.float32) * s1_ref[...] + t1_ref[...],
                    0.0)
    y = _conv3x3_reflect_im2col(z, w_ref[...], hi_ref[...], wi_ref[...], H=H, W=W)
    y2_ref[...] = y.astype(y2_ref.dtype)
    _store_partial_stats(y, stats_ref)


def _bn2_residual_kernel(y2_ref, x_ref, s2_ref, t2_ref, o_ref):
    """BN2 (precomputed scale/shift) + residual add.  Lane-dense VPU work."""
    o_ref[...] = (y2_ref[...].astype(jnp.float32) * s2_ref[...] + t2_ref[...]
                  + x_ref[...]).astype(o_ref.dtype)


@jax.jit
def residual_block_batchnorm(x_nchw, w1, b1, g1, be1, w2, b2, g2, be2):
    """x_nchw: (B, C, H, W) f32.  w*: (3, 3, Cin, Cout).  b*/g*/be*: (1, C).

    Conv biases b1/b2 are accepted for module parity but are mathematically
    absorbed by the batch-statistics BatchNorm that immediately follows each
    conv, so they are not fed to the kernels.
    """
    B, C, H, W = x_nchw.shape
    if H < 2 or W < 2:
        raise ValueError("ReflectionPad2d(1) requires H >= 2 and W >= 2.")
    HW = H * W

    x = x_nchw.reshape(B, C, HW).astype(jnp.float32)
    # (kh, kw, Cin, Cout) -> (Cout, 9*Cin), tap-major, bf16 MXU operand.
    w1m = jnp.transpose(w1, (3, 0, 1, 2)).reshape(C, 9 * C).astype(MXU_DTYPE)
    w2m = jnp.transpose(w2, (3, 0, 1, 2)).reshape(C, 9 * C).astype(MXU_DTYPE)

    # Grid-invariant row/col index maps for the reflection masks (hoisted).
    hi = jnp.broadcast_to(jnp.arange(H, dtype=jnp.float32)[:, None],
                          (H, W)).reshape(1, HW)
    wi = jnp.broadcast_to(jnp.arange(W, dtype=jnp.float32)[None, :],
                          (H, W)).reshape(1, HW)

    act_spec = pl.BlockSpec((None, C, HW), lambda b: (b, 0, 0))   # per-image block
    stats_spec = pl.BlockSpec((None, C, 2), lambda b: (b, 0, 0))  # per-step partials
    col_spec = pl.BlockSpec((C, 1), lambda b: (0, 0))             # resident column
    w_spec = pl.BlockSpec((C, 9 * C), lambda b: (0, 0))           # resident weights
    idx_spec = pl.BlockSpec((1, HW), lambda b: (0, 0))            # resident indices

    y_bf16 = jax.ShapeDtypeStruct((B, C, HW), MXU_DTYPE)
    stats_f32 = jax.ShapeDtypeStruct((B, C, 2), jnp.float32)

    params = pltpu.CompilerParams(
        dimension_semantics=("parallel",),          # batch axis megacore-splittable
        vmem_limit_bytes=64 * 1024 * 1024,
    )

    # --- conv1 + per-image BN1 partial statistics -----------------------------
    y1, stats1 = pl.pallas_call(
        functools.partial(_conv1_kernel, H=H, W=W),
        grid=(B,),
        in_specs=[act_spec, w_spec, idx_spec, idx_spec],
        out_specs=[act_spec, stats_spec],
        out_shape=[y_bf16, stats_f32],
        compiler_params=params,
    )(x, w1m, hi, wi)

    inv_n = 1.0 / float(B * HW)
    sum1 = jnp.sum(stats1[:, :, 0], axis=0).reshape(C, 1)
    ssq1 = jnp.sum(stats1[:, :, 1], axis=0).reshape(C, 1)
    mean1 = sum1 * inv_n
    var1 = jnp.maximum(ssq1 * inv_n - mean1 * mean1, 0.0)   # single-pass biased var
    scale1 = g1.reshape(C, 1).astype(jnp.float32) * jax.lax.rsqrt(var1 + BN_EPS)
    shift1 = be1.reshape(C, 1).astype(jnp.float32) - mean1 * scale1

    # --- BN1 + ReLU + conv2 + per-image BN2 partial statistics ----------------
    y2, stats2 = pl.pallas_call(
        functools.partial(_conv2_kernel, H=H, W=W),
        grid=(B,),
        in_specs=[act_spec, col_spec, col_spec, w_spec, idx_spec, idx_spec],
        out_specs=[act_spec, stats_spec],
        out_shape=[y_bf16, stats_f32],
        compiler_params=params,
    )(y1, scale1, shift1, w2m, hi, wi)

    sum2 = jnp.sum(stats2[:, :, 0], axis=0).reshape(C, 1)
    ssq2 = jnp.sum(stats2[:, :, 1], axis=0).reshape(C, 1)
    mean2 = sum2 * inv_n
    var2 = jnp.maximum(ssq2 * inv_n - mean2 * mean2, 0.0)
    scale2 = g2.reshape(C, 1).astype(jnp.float32) * jax.lax.rsqrt(var2 + BN_EPS)
    shift2 = be2.reshape(C, 1).astype(jnp.float32) - mean2 * scale2

    # --- BN2 + residual add ---------------------------------------------------
    out = pl.pallas_call(
        _bn2_residual_kernel,
        grid=(B,),
        in_specs=[act_spec, act_spec, col_spec, col_spec],
        out_specs=act_spec,
        out_shape=jax.ShapeDtypeStruct((B, C, HW), x_nchw.dtype),
        compiler_params=params,
    )(y2, x, scale2, shift2)

    return out.reshape(B, C, H, W)


# -----------------------------------------------------------------------------
# Pure-JAX references.
# -----------------------------------------------------------------------------
def _bf16_round(t):
    return t.astype(jnp.bfloat16).astype(jnp.float32)


def _conv3x3_reflect(t, w_khkwio, bias=None, *, round_mxu=False):
    tp = jnp.pad(t, ((0, 0), (0, 0), (1, 1), (1, 1)), mode="reflect")
    w_oihw = jnp.transpose(w_khkwio, (3, 2, 0, 1))
    if round_mxu:
        tp, w_oihw = _bf16_round(tp), _bf16_round(w_oihw)
    y = jax.lax.conv_general_dilated(
        tp, w_oihw, window_strides=(1, 1), padding="VALID",
        dimension_numbers=("NCHW", "OIHW", "NCHW"),
        precision=jax.lax.Precision.HIGHEST,
        preferred_element_type=jnp.float32)
    if bias is not None:
        y = y + bias.reshape(1, -1, 1, 1)
    return y


def _bn_scale_shift(y, g, be):
    mean = y.mean(axis=(0, 2, 3), keepdims=True)
    var = jnp.maximum((y * y).mean(axis=(0, 2, 3), keepdims=True) - mean * mean, 0.0)
    scale = g.reshape(1, -1, 1, 1) * jax.lax.rsqrt(var + BN_EPS)
    shift = be.reshape(1, -1, 1, 1) - mean * scale
    return scale, shift


def _reference_pytorch_f32(x, w1, b1, g1, be1, w2, b2, g2, be2):
    """Mirrors the PyTorch forward exactly (biases, f32 everywhere)."""
    y1 = _conv3x3_reflect(x, w1, b1)
    s1, t1 = _bn_scale_shift(y1, g1, be1)
    z = jax.nn.relu(y1 * s1 + t1)
    y2 = _conv3x3_reflect(z, w2, b2)
    s2, t2 = _bn_scale_shift(y2, g2, be2)
    return y2 * s2 + t2 + x


def _reference_kernel_mirror(x, w1, g1, be1, w2, g2, be2):
    """Bit-level mirror of the Pallas pipeline: no conv bias, bf16 MXU operands,
    f32 accumulation, stats from f32 conv output, bf16 storage of y1/y2."""
    y1 = _conv3x3_reflect(x, w1, None, round_mxu=True)
    s1, t1 = _bn_scale_shift(y1, g1, be1)
    z = jax.nn.relu(_bf16_round(y1) * s1 + t1)
    y2 = _conv3x3_reflect(z, w2, None, round_mxu=True)
    s2, t2 = _bn_scale_shift(y2, g2, be2)
    return _bf16_round(y2) * s2 + t2 + x


if __name__ == "__main__":
    B, C, H, W = 2, 4, 16, 16
    key = jax.random.PRNGKey(0)
    kx, kw1, kb1, kg1, kbe1, kw2, kb2, kg2, kbe2 = jax.random.split(key, 9)

    x = jax.random.normal(kx, (B, C, H, W), jnp.float32)
    w1 = 0.1 * jax.random.normal(kw1, (3, 3, C, C), jnp.float32)
    b1 = 0.1 * jax.random.normal(kb1, (1, C), jnp.float32)
    g1 = 1.0 + 0.1 * jax.random.normal(kg1, (1, C), jnp.float32)
    be1 = 0.1 * jax.random.normal(kbe1, (1, C), jnp.float32)
    w2 = 0.1 * jax.random.normal(kw2, (3, 3, C, C), jnp.float32)
    b2 = 0.1 * jax.random.normal(kb2, (1, C), jnp.float32)
    g2 = 1.0 + 0.1 * jax.random.normal(kg2, (1, C), jnp.float32)
    be2 = 0.1 * jax.random.normal(kbe2, (1, C), jnp.float32)

    out = jax.block_until_ready(
        residual_block_batchnorm(x, w1, b1, g1, be1, w2, b2, g2, be2))
    assert out.shape == (B, C, H, W)

    # Tight check vs a reference that mirrors the kernel's bf16 handling exactly.
    ref_mirror = _reference_kernel_mirror(x, w1, g1, be1, w2, g2, be2)
    err_m = float(jnp.max(jnp.abs(out - ref_mirror)))
    assert jnp.allclose(out, ref_mirror, atol=5e-3, rtol=5e-3), \
        f"kernel-mirror reference: max abs diff = {err_m}"

    # Looser check vs the pure-f32 PyTorch-equivalent reference (bf16 MXU
    # operands + bf16 activation storage introduce ~1e-2-level deviations).
    ref_f32 = _reference_pytorch_f32(x, w1, b1, g1, be1, w2, b2, g2, be2)
    err_f = float(jnp.max(jnp.abs(out - ref_f32)))
    assert jnp.allclose(out, ref_f32, atol=3e-2, rtol=3e-2), \
        f"f32 reference: max abs diff = {err_f}"

    print("KERNEL_OK")
</pallas_src>

<mosaic_0001>
module attributes {stable_mosaic.version = 11 : i64} {
  func.func @_bn2_residual_kernel(%arg0: i32, %arg1: memref<1x4x256xbf16, #tpu.memory_space<vmem>>, %arg2: memref<1x4x256xf32, #tpu.memory_space<vmem>>, %arg3: memref<4x1xf32, #tpu.memory_space<vmem>>, %arg4: memref<4x1xf32, #tpu.memory_space<vmem>>, %arg5: memref<1x4x256xf32, #tpu.memory_space<vmem>>) attributes {dimension_semantics = [#tpu.dimension_semantics<parallel>], iteration_bounds = array<i64: 2>, scalar_prefetch = 0 : i64, scratch_operands = 0 : i64, tpu.core_type = #tpu.core_type<tc>, window_params = [{transform_indices = @transform_0, window_bounds = array<i64: 1, 4, 256>}, {transform_indices = @transform_1, window_bounds = array<i64: 1, 4, 256>}, {pipeline_mode = #tpu.pipeline_mode<synchronous>, transform_indices = @transform_2, window_bounds = array<i64: 4, 1>}, {pipeline_mode = #tpu.pipeline_mode<synchronous>, transform_indices = @transform_3, window_bounds = array<i64: 4, 1>}, {transform_indices = @transform_4, window_bounds = array<i64: 1, 4, 256>}]} {
    %c0 = arith.constant 0 : index
    %c0_0 = arith.constant 0 : index
    %c0_1 = arith.constant 0 : index
    %0 = vector.load %arg1[%c0, %c0_0, %c0_1] : memref<1x4x256xbf16, #tpu.memory_space<vmem>>, vector<1x4x256xbf16>
    %1 = vector.shape_cast %0 : vector<1x4x256xbf16> to vector<4x256xbf16>
    %2 = arith.extf %1 : vector<4x256xbf16> to vector<4x256xf32>
    %c0_2 = arith.constant 0 : index
    %c0_3 = arith.constant 0 : index
    %3 = vector.load %arg3[%c0_2, %c0_3] : memref<4x1xf32, #tpu.memory_space<vmem>>, vector<4x1xf32>
    %4 = vector.broadcast %3 : vector<4x1xf32> to vector<4x256xf32>
    %5 = arith.mulf %2, %4 : vector<4x256xf32>
    %c0_4 = arith.constant 0 : index
    %c0_5 = arith.constant 0 : index
    %6 = vector.load %arg4[%c0_4, %c0_5] : memref<4x1xf32, #tpu.memory_space<vmem>>, vector<4x1xf32>
    %7 = vector.broadcast %6 : vector<4x1xf32> to vector<4x256xf32>
    %8 = arith.addf %5, %7 : vector<4x256xf32>
    %c0_6 = arith.constant 0 : index
    %c0_7 = arith.constant 0 : index
    %c0_8 = arith.constant 0 : index
    %9 = vector.load %arg2[%c0_6, %c0_7, %c0_8] : memref<1x4x256xf32, #tpu.memory_space<vmem>>, vector<1x4x256xf32>
    %10 = vector.shape_cast %9 : vector<1x4x256xf32> to vector<4x256xf32>
    %11 = arith.addf %8, %10 : vector<4x256xf32>
    %c0_9 = arith.constant 0 : index
    %c0_10 = arith.constant 0 : index
    %c0_11 = arith.constant 0 : index
    %12 = vector.load %arg5[%c0_9, %c0_10, %c0_11] : memref<1x4x256xf32, #tpu.memory_space<vmem>>, vector<1x4x256xf32>
    %13 = vector.shape_cast %12 : vector<1x4x256xf32> to vector<4x256xf32>
    %14 = vector.shape_cast %11 : vector<4x256xf32> to vector<1x4x256xf32>
    tpu.vector_store %arg5[%c0_9, %c0_10, %c0_11], %14 {strides = array<i32>} : memref<1x4x256xf32, #tpu.memory_space<vmem>>, vector<1x4x256xf32>,
    return
  }
  func.func @transform_0(%arg0: i32) -> (i32, i32, i32) {
    %c0_i32 = arith.constant 0 : i32
    %c0_i32_0 = arith.constant 0 : i32
    %c0_i32_1 = arith.constant 0 : i32
    return %arg0, %c0_i32, %c0_i32_0 : i32, i32, i32
  }
  func.func @transform_1(%arg0: i32) -> (i32, i32, i32) {
    %c0_i32 = arith.constant 0 : i32
    %c0_i32_0 = arith.constant 0 : i32
    %c0_i32_1 = arith.constant 0 : i32
    return %arg0, %c0_i32, %c0_i32_0 : i32, i32, i32
  }
  func.func @transform_2(%arg0: i32) -> (i32, i32) {
    %c0_i32 = arith.constant 0 : i32
    %c0_i32_0 = arith.constant 0 : i32
    %c0_i32_1 = arith.constant 0 : i32
    return %c0_i32, %c0_i32_0 : i32, i32
  }
  func.func @transform_3(%arg0: i32) -> (i32, i32) {
    %c0_i32 = arith.constant 0 : i32
    %c0_i32_0 = arith.constant 0 : i32
    %c0_i32_1 = arith.constant 0 : i32
    return %c0_i32, %c0_i32_0 : i32, i32
  }
  func.func @transform_4(%arg0: i32) -> (i32, i32, i32) {
    %c0_i32 = arith.constant 0 : i32
    %c0_i32_0 = arith.constant 0 : i32
    %c0_i32_1 = arith.constant 0 : i32
    return %arg0, %c0_i32, %c0_i32_0 : i32, i32, i32
  }
}

module attributes {stable_mosaic.version = 11 : i64} {
  func.func @_conv1_kernel(%arg0: i32, %arg1: memref<1x4x256xf32, #tpu.memory_space<vmem>>, %arg2: memref<4x36xbf16, #tpu.memory_space<vmem>>, %arg3: memref<1x256xf32, #tpu.memory_space<vmem>>, %arg4: memref<1x256xf32, #tpu.memory_space<vmem>>, %arg5: memref<1x4x256xbf16, #tpu.memory_space<vmem>>, %arg6: memref<1x4x2xf32, #tpu.memory_space<vmem>>) attributes {dimension_semantics = [#tpu.dimension_semantics<parallel>], iteration_bounds = array<i64: 2>, scalar_prefetch = 0 : i64, scratch_operands = 0 : i64, tpu.core_type = #tpu.core_type<tc>, window_params = [{transform_indices = @transform_0, window_bounds = array<i64: 1, 4, 256>}, {pipeline_mode = #tpu.pipeline_mode<synchronous>, transform_indices = @transform_1, window_bounds = array<i64: 4, 36>}, {pipeline_mode = #tpu.pipeline_mode<synchronous>, transform_indices = @transform_2, window_bounds = array<i64: 1, 256>}, {pipeline_mode = #tpu.pipeline_mode<synchronous>, transform_indices = @transform_3, window_bounds = array<i64: 1, 256>}, {transform_indices = @transform_4, window_bounds = array<i64: 1, 4, 256>}, {transform_indices = @transform_5, window_bounds = array<i64: 1, 4, 2>}]} {
    %c0 = arith.constant 0 : index
    %c0_0 = arith.constant 0 : index
    %c0_1 = arith.constant 0 : index
    %0 = vector.load %arg1[%c0, %c0_0, %c0_1] : memref<1x4x256xf32, #tpu.memory_space<vmem>>, vector<1x4x256xf32>
    %1 = vector.shape_cast %0 : vector<1x4x256xf32> to vector<4x256xf32>
    %c0_2 = arith.constant 0 : index
    %c0_3 = arith.constant 0 : index
    %2 = vector.load %arg2[%c0_2, %c0_3] : memref<4x36xbf16, #tpu.memory_space<vmem>>, vector<4x36xbf16>
    %c0_4 = arith.constant 0 : index
    %c0_5 = arith.constant 0 : index
    %3 = vector.load %arg3[%c0_4, %c0_5] : memref<1x256xf32, #tpu.memory_space<vmem>>, vector<1x256xf32>
    %c0_6 = arith.constant 0 : index
    %c0_7 = arith.constant 0 : index
    %4 = vector.load %arg4[%c0_6, %c0_7] : memref<1x256xf32, #tpu.memory_space<vmem>>, vector<1x256xf32>
    %c17_i32 = arith.constant 17 : i32
    %5 = tpu.dynamic_rotate %1 by %c17_i32 dim 1 : vector<4x256xf32>, i32 -> vector<4x256xf32>
    %c16_i32 = arith.constant 16 : i32
    %6 = tpu.dynamic_rotate %1 by %c16_i32 dim 1 : vector<4x256xf32>, i32 -> vector<4x256xf32>
    %c15_i32 = arith.constant 15 : i32
    %7 = tpu.dynamic_rotate %1 by %c15_i32 dim 1 : vector<4x256xf32>, i32 -> vector<4x256xf32>
    %c1_i32 = arith.constant 1 : i32
    %8 = tpu.dynamic_rotate %1 by %c1_i32 dim 1 : vector<4x256xf32>, i32 -> vector<4x256xf32>
    %c255_i32 = arith.constant 255 : i32
    %9 = tpu.dynamic_rotate %1 by %c255_i32 dim 1 : vector<4x256xf32>, i32 -> vector<4x256xf32>
    %c241_i32 = arith.constant 241 : i32
    %10 = tpu.dynamic_rotate %1 by %c241_i32 dim 1 : vector<4x256xf32>, i32 -> vector<4x256xf32>
    %c240_i32 = arith.constant 240 : i32
    %11 = tpu.dynamic_rotate %1 by %c240_i32 dim 1 : vector<4x256xf32>, i32 -> vector<4x256xf32>
    %c239_i32 = arith.constant 239 : i32
    %12 = tpu.dynamic_rotate %1 by %c239_i32 dim 1 : vector<4x256xf32>, i32 -> vector<4x256xf32>
    %cst = arith.constant 0.000000e+00 : f32
    %13 = vector.broadcast %cst : f32 to vector<1x256xf32>
    %14 = arith.cmpf oeq, %3, %13 : vector<1x256xf32>
    %cst_8 = arith.constant 1.500000e+01 : f32
    %15 = vector.broadcast %cst_8 : f32 to vector<1x256xf32>
    %16 = arith.cmpf oeq, %3, %15 : vector<1x256xf32>
    %cst_9 = arith.constant 0.000000e+00 : f32
    %17 = vector.broadcast %cst_9 : f32 to vector<1x256xf32>
    %18 = arith.cmpf oeq, %4, %17 : vector<1x256xf32>
    %cst_10 = arith.constant 1.500000e+01 : f32
    %19 = vector.broadcast %cst_10 : f32 to vector<1x256xf32>
    %20 = arith.cmpf oeq, %4, %19 : vector<1x256xf32>
    %21 = vector.shape_cast %18 : vector<1x256xi1> to vector<1x256xi1>
    %22 = vector.broadcast %21 : vector<1x256xi1> to vector<4x256xi1>
    %23 = arith.select %22, %7, %5 : vector<4x256xi1>, vector<4x256xf32>
    %24 = vector.shape_cast %18 : vector<1x256xi1> to vector<1x256xi1>
    %25 = vector.broadcast %24 : vector<1x256xi1> to vector<4x256xi1>
    %26 = arith.select %25, %12, %10 : vector<4x256xi1>, vector<4x256xf32>
    %27 = vector.shape_cast %14 : vector<1x256xi1> to vector<1x256xi1>
    %28 = vector.broadcast %27 : vector<1x256xi1> to vector<4x256xi1>
    %29 = arith.select %28, %26, %23 : vector<4x256xi1>, vector<4x256xf32>
    %30 = arith.truncf %29 : vector<4x256xf32> to vector<4x256xbf16>
    %31 = vector.shape_cast %14 : vector<1x256xi1> to vector<1x256xi1>
    %32 = vector.broadcast %31 : vector<1x256xi1> to vector<4x256xi1>
    %33 = arith.select %32, %11, %6 : vector<4x256xi1>, vector<4x256xf32>
    %34 = arith.truncf %33 : vector<4x256xf32> to vector<4x256xbf16>
    %35 = vector.shape_cast %20 : vector<1x256xi1> to vector<1x256xi1>
    %36 = vector.broadcast %35 : vector<1x256xi1> to vector<4x256xi1>
    %37 = arith.select %36, %5, %7 : vector<4x256xi1>, vector<4x256xf32>
    %38 = vector.shape_cast %20 : vector<1x256xi1> to vector<1x256xi1>
    %39 = vector.broadcast %38 : vector<1x256xi1> to vector<4x256xi1>
    %40 = arith.select %39, %10, %12 : vector<4x256xi1>, vector<4x256xf32>
    %41 = vector.shape_cast %14 : vector<1x256xi1> to vector<1x256xi1>
    %42 = vector.broadcast %41 : vector<1x256xi1> to vector<4x256xi1>
    %43 = arith.select %42, %40, %37 : vector<4x256xi1>, vector<4x256xf32>
    %44 = arith.truncf %43 : vector<4x256xf32> to vector<4x256xbf16>
    %45 = vector.shape_cast %18 : vector<1x256xi1> to vector<1x256xi1>
    %46 = vector.broadcast %45 : vector<1x256xi1> to vector<4x256xi1>
    %47 = arith.select %46, %9, %8 : vector<4x256xi1>, vector<4x256xf32>
    %48 = arith.truncf %47 : vector<4x256xf32> to vector<4x256xbf16>
    %49 = arith.truncf %1 : vector<4x256xf32> to vector<4x256xbf16>
    %50 = vector.shape_cast %20 : vector<1x256xi1> to vector<1x256xi1>
    %51 = vector.broadcast %50 : vector<1x256xi1> to vector<4x256xi1>
    %52 = arith.select %51, %8, %9 : vector<4x256xi1>, vector<4x256xf32>
    %53 = arith.truncf %52 : vector<4x256xf32> to vector<4x256xbf16>
    %54 = vector.shape_cast %18 : vector<1x256xi1> to vector<1x256xi1>
    %55 = vector.broadcast %54 : vector<1x256xi1> to vector<4x256xi1>
    %56 = arith.select %55, %12, %10 : vector<4x256xi1>, vector<4x256xf32>
    %57 = vector.shape_cast %18 : vector<1x256xi1> to vector<1x256xi1>
    %58 = vector.broadcast %57 : vector<1x256xi1> to vector<4x256xi1>
    %59 = arith.select %58, %7, %5 : vector<4x256xi1>, vector<4x256xf32>
    %60 = vector.shape_cast %16 : vector<1x256xi1> to vector<1x256xi1>
    %61 = vector.broadcast %60 : vector<1x256xi1> to vector<4x256xi1>
    %62 = arith.select %61, %59, %56 : vector<4x256xi1>, vector<4x256xf32>
    %63 = arith.truncf %62 : vector<4x256xf32> to vector<4x256xbf16>
    %64 = vector.shape_cast %16 : vector<1x256xi1> to vector<1x256xi1>
    %65 = vector.broadcast %64 : vector<1x256xi1> to vector<4x256xi1>
    %66 = arith.select %65, %6, %11 : vector<4x256xi1>, vector<4x256xf32>
    %67 = arith.truncf %66 : vector<4x256xf32> to vector<4x256xbf16>
    %68 = vector.shape_cast %20 : vector<1x256xi1> to vector<1x256xi1>
    %69 = vector.broadcast %68 : vector<1x256xi1> to vector<4x256xi1>
    %70 = arith.select %69, %10, %12 : vector<4x256xi1>, vector<4x256xf32>
    %71 = vector.shape_cast %20 : vector<1x256xi1> to vector<1x256xi1>
    %72 = vector.broadcast %71 : vector<1x256xi1> to vector<4x256xi1>
    %73 = arith.select %72, %5, %7 : vector<4x256xi1>, vector<4x256xf32>
    %74 = vector.shape_cast %16 : vector<1x256xi1> to vector<1x256xi1>
    %75 = vector.broadcast %74 : vector<1x256xi1> to vector<4x256xi1>
    %76 = arith.select %75, %73, %70 : vector<4x256xi1>, vector<4x256xf32>
    %77 = arith.truncf %76 : vector<4x256xf32> to vector<4x256xbf16>
    %78 = tpu.concatenate %30, %34, %44, %48, %49, %53, %63, %67, %77 in 0 : vector<4x256xbf16>, vector<4x256xbf16>, vector<4x256xbf16>, vector<4x256xbf16>, vector<4x256xbf16>, vector<4x256xbf16>, vector<4x256xbf16>, vector<4x256xbf16>, vector<4x256xbf16> -> vector<36x256xbf16>
    %cst_11 = arith.constant dense<0.000000e+00> : vector<4x256xf32>
    %79 = tpu.matmul %2, %78, %cst_11 {dimension_numbers = #tpu.dot_dimension_numbers<[1], [0], [0], [1], [0, 0, 1, 1], [], []>} : vector<4x36xbf16>, vector<36x256xbf16>, vector<4x256xf32> -> vector<4x256xf32>
    %80 = arith.truncf %79 : vector<4x256xf32> to vector<4x256xbf16>
    %c0_12 = arith.constant 0 : index
    %c0_13 = arith.constant 0 : index
    %c0_14 = arith.constant 0 : index
    %81 = vector.load %arg5[%c0_12, %c0_13, %c0_14] : memref<1x4x256xbf16, #tpu.memory_space<vmem>>, vector<1x4x256xbf16>
    %82 = vector.shape_cast %81 : vector<1x4x256xbf16> to vector<4x256xbf16>
    %83 = vector.shape_cast %80 : vector<4x256xbf16> to vector<1x4x256xbf16>
    tpu.vector_store %arg5[%c0_12, %c0_13, %c0_14], %83 {strides = array<i32>} : memref<1x4x256xbf16, #tpu.memory_space<vmem>>, vector<1x4x256xbf16>,
    %cst_15 = arith.constant dense<0.000000e+00> : vector<4xf32>
    %84 = vector.multi_reduction <add>, %79, %cst_15 [1] : vector<4x256xf32> to vector<4xf32>
    %85 = vector.shape_cast %84 : vector<4xf32> to vector<4x1xf32>
    %86 = arith.mulf %79, %79 : vector<4x256xf32>
    %cst_16 = arith.constant dense<0.000000e+00> : vector<4xf32>
    %87 = vector.multi_reduction <add>, %86, %cst_16 [1] : vector<4x256xf32> to vector<4xf32>
    %88 = vector.shape_cast %87 : vector<4xf32> to vector<4x1xf32>
    %89 = tpu.concatenate %85, %88 in 1 : vector<4x1xf32>, vector<4x1xf32> -> vector<4x2xf32>
    %c0_17 = arith.constant 0 : index
    %c0_18 = arith.constant 0 : index
    %c0_19 = arith.constant 0 : index
    %90 = vector.load %arg6[%c0_17, %c0_18, %c0_19] : memref<1x4x2xf32, #tpu.memory_space<vmem>>, vector<1x4x2xf32>
    %91 = vector.shape_cast %90 : vector<1x4x2xf32> to vector<4x2xf32>
    %92 = vector.shape_cast %89 : vector<4x2xf32> to vector<1x4x2xf32>
    tpu.vector_store %arg6[%c0_17, %c0_18, %c0_19], %92 {strides = array<i32>} : memref<1x4x2xf32, #tpu.memory_space<vmem>>, vector<1x4x2xf32>,
    return
  }
  func.func @transform_0(%arg0: i32) -> (i32, i32, i32) {
    %c0_i32 = arith.constant 0 : i32
    %c0_i32_0 = arith.constant 0 : i32
    %c0_i32_1 = arith.constant 0 : i32
    return %arg0, %c0_i32, %c0_i32_0 : i32, i32, i32
  }
  func.func @transform_1(%arg0: i32) -> (i32, i32) {
    %c0_i32 = arith.constant 0 : i32
    %c0_i32_0 = arith.constant 0 : i32
    %c0_i32_1 = arith.constant 0 : i32
    return %c0_i32, %c0_i32_0 : i32, i32
  }
  func.func @transform_2(%arg0: i32) -> (i32, i32) {
    %c0_i32 = arith.constant 0 : i32
    %c0_i32_0 = arith.constant 0 : i32
    %c0_i32_1 = arith.constant 0 : i32
    return %c0_i32, %c0_i32_0 : i32, i32
  }
  func.func @transform_3(%arg0: i32) -> (i32, i32) {
    %c0_i32 = arith.constant 0 : i32
    %c0_i32_0 = arith.constant 0 : i32
    %c0_i32_1 = arith.constant 0 : i32
    return %c0_i32, %c0_i32_0 : i32, i32
  }
  func.func @transform_4(%arg0: i32) -> (i32, i32, i32) {
    %c0_i32 = arith.constant 0 : i32
    %c0_i32_0 = arith.constant 0 : i32
    %c0_i32_1 = arith.constant 0 : i32
    return %arg0, %c0_i32, %c0_i32_0 : i32, i32, i32
  }
  func.func @transform_5(%arg0: i32) -> (i32, i32, i32) {
    %c0_i32 = arith.constant 0 : i32
    %c0_i32_0 = arith.constant 0 : i32
    %c0_i32_1 = arith.constant 0 : i32
    return %arg0, %c0_i32, %c0_i32_0 : i32, i32, i32
  }
}

module attributes {stable_mosaic.version = 11 : i64} {
  func.func @_conv2_kernel(%arg0: i32, %arg1: memref<1x4x256xbf16, #tpu.memory_space<vmem>>, %arg2: memref<4x1xf32, #tpu.memory_space<vmem>>, %arg3: memref<4x1xf32, #tpu.memory_space<vmem>>, %arg4: memref<4x36xbf16, #tpu.memory_space<vmem>>, %arg5: memref<1x256xf32, #tpu.memory_space<vmem>>, %arg6: memref<1x256xf32, #tpu.memory_space<vmem>>, %arg7: memref<1x4x256xbf16, #tpu.memory_space<vmem>>, %arg8: memref<1x4x2xf32, #tpu.memory_space<vmem>>) attributes {dimension_semantics = [#tpu.dimension_semantics<parallel>], iteration_bounds = array<i64: 2>, scalar_prefetch = 0 : i64, scratch_operands = 0 : i64, tpu.core_type = #tpu.core_type<tc>, window_params = [{transform_indices = @transform_0, window_bounds = array<i64: 1, 4, 256>}, {pipeline_mode = #tpu.pipeline_mode<synchronous>, transform_indices = @transform_1, window_bounds = array<i64: 4, 1>}, {pipeline_mode = #tpu.pipeline_mode<synchronous>, transform_indices = @transform_2, window_bounds = array<i64: 4, 1>}, {pipeline_mode = #tpu.pipeline_mode<synchronous>, transform_indices = @transform_3, window_bounds = array<i64: 4, 36>}, {pipeline_mode = #tpu.pipeline_mode<synchronous>, transform_indices = @transform_4, window_bounds = array<i64: 1, 256>}, {pipeline_mode = #tpu.pipeline_mode<synchronous>, transform_indices = @transform_5, window_bounds = array<i64: 1, 256>}, {transform_indices = @transform_6, window_bounds = array<i64: 1, 4, 256>}, {transform_indices = @transform_7, window_bounds = array<i64: 1, 4, 2>}]} {
    %c0 = arith.constant 0 : index
    %c0_0 = arith.constant 0 : index
    %c0_1 = arith.constant 0 : index
    %0 = vector.load %arg1[%c0, %c0_0, %c0_1] : memref<1x4x256xbf16, #tpu.memory_space<vmem>>, vector<1x4x256xbf16>
    %1 = vector.shape_cast %0 : vector<1x4x256xbf16> to vector<4x256xbf16>
    %2 = arith.extf %1 : vector<4x256xbf16> to vector<4x256xf32>
    %c0_2 = arith.constant 0 : index
    %c0_3 = arith.constant 0 : index
    %3 = vector.load %arg2[%c0_2, %c0_3] : memref<4x1xf32, #tpu.memory_space<vmem>>, vector<4x1xf32>
    %4 = vector.broadcast %3 : vector<4x1xf32> to vector<4x256xf32>
    %5 = arith.mulf %2, %4 : vector<4x256xf32>
    %c0_4 = arith.constant 0 : index
    %c0_5 = arith.constant 0 : index
    %6 = vector.load %arg3[%c0_4, %c0_5] : memref<4x1xf32, #tpu.memory_space<vmem>>, vector<4x1xf32>
    %7 = vector.broadcast %6 : vector<4x1xf32> to vector<4x256xf32>
    %8 = arith.addf %5, %7 : vector<4x256xf32>
    %cst = arith.constant 0.000000e+00 : f32
    %9 = vector.broadcast %cst : f32 to vector<4x256xf32>
    %10 = arith.maximumf %8, %9 : vector<4x256xf32>
    %c0_6 = arith.constant 0 : index
    %c0_7 = arith.constant 0 : index
    %11 = vector.load %arg4[%c0_6, %c0_7] : memref<4x36xbf16, #tpu.memory_space<vmem>>, vector<4x36xbf16>
    %c0_8 = arith.constant 0 : index
    %c0_9 = arith.constant 0 : index
    %12 = vector.load %arg5[%c0_8, %c0_9] : memref<1x256xf32, #tpu.memory_space<vmem>>, vector<1x256xf32>
    %c0_10 = arith.constant 0 : index
    %c0_11 = arith.constant 0 : index
    %13 = vector.load %arg6[%c0_10, %c0_11] : memref<1x256xf32, #tpu.memory_space<vmem>>, vector<1x256xf32>
    %c17_i32 = arith.constant 17 : i32
    %14 = tpu.dynamic_rotate %10 by %c17_i32 dim 1 : vector<4x256xf32>, i32 -> vector<4x256xf32>
    %c16_i32 = arith.constant 16 : i32
    %15 = tpu.dynamic_rotate %10 by %c16_i32 dim 1 : vector<4x256xf32>, i32 -> vector<4x256xf32>
    %c15_i32 = arith.constant 15 : i32
    %16 = tpu.dynamic_rotate %10 by %c15_i32 dim 1 : vector<4x256xf32>, i32 -> vector<4x256xf32>
    %c1_i32 = arith.constant 1 : i32
    %17 = tpu.dynamic_rotate %10 by %c1_i32 dim 1 : vector<4x256xf32>, i32 -> vector<4x256xf32>
    %c255_i32 = arith.constant 255 : i32
    %18 = tpu.dynamic_rotate %10 by %c255_i32 dim 1 : vector<4x256xf32>, i32 -> vector<4x256xf32>
    %c241_i32 = arith.constant 241 : i32
    %19 = tpu.dynamic_rotate %10 by %c241_i32 dim 1 : vector<4x256xf32>, i32 -> vector<4x256xf32>
    %c240_i32 = arith.constant 240 : i32
    %20 = tpu.dynamic_rotate %10 by %c240_i32 dim 1 : vector<4x256xf32>, i32 -> vector<4x256xf32>
    %c239_i32 = arith.constant 239 : i32
    %21 = tpu.dynamic_rotate %10 by %c239_i32 dim 1 : vector<4x256xf32>, i32 -> vector<4x256xf32>
    %cst_12 = arith.constant 0.000000e+00 : f32
    %22 = vector.broadcast %cst_12 : f32 to vector<1x256xf32>
    %23 = arith.cmpf oeq, %12, %22 : vector<1x256xf32>
    %cst_13 = arith.constant 1.500000e+01 : f32
    %24 = vector.broadcast %cst_13 : f32 to vector<1x256xf32>
    %25 = arith.cmpf oeq, %12, %24 : vector<1x256xf32>
    %cst_14 = arith.constant 0.000000e+00 : f32
    %26 = vector.broadcast %cst_14 : f32 to vector<1x256xf32>
    %27 = arith.cmpf oeq, %13, %26 : vector<1x256xf32>
    %cst_15 = arith.constant 1.500000e+01 : f32
    %28 = vector.broadcast %cst_15 : f32 to vector<1x256xf32>
    %29 = arith.cmpf oeq, %13, %28 : vector<1x256xf32>
    %30 = vector.shape_cast %27 : vector<1x256xi1> to vector<1x256xi1>
    %31 = vector.broadcast %30 : vector<1x256xi1> to vector<4x256xi1>
    %32 = arith.select %31, %16, %14 : vector<4x256xi1>, vector<4x256xf32>
    %33 = vector.shape_cast %27 : vector<1x256xi1> to vector<1x256xi1>
    %34 = vector.broadcast %33 : vector<1x256xi1> to vector<4x256xi1>
    %35 = arith.select %34, %21, %19 : vector<4x256xi1>, vector<4x256xf32>
    %36 = vector.shape_cast %23 : vector<1x256xi1> to vector<1x256xi1>
    %37 = vector.broadcast %36 : vector<1x256xi1> to vector<4x256xi1>
    %38 = arith.select %37, %35, %32 : vector<4x256xi1>, vector<4x256xf32>
    %39 = arith.truncf %38 : vector<4x256xf32> to vector<4x256xbf16>
    %40 = vector.shape_cast %23 : vector<1x256xi1> to vector<1x256xi1>
    %41 = vector.broadcast %40 : vector<1x256xi1> to vector<4x256xi1>
    %42 = arith.select %41, %20, %15 : vector<4x256xi1>, vector<4x256xf32>
    %43 = arith.truncf %42 : vector<4x256xf32> to vector<4x256xbf16>
    %44 = vector.shape_cast %29 : vector<1x256xi1> to vector<1x256xi1>
    %45 = vector.broadcast %44 : vector<1x256xi1> to vector<4x256xi1>
    %46 = arith.select %45, %14, %16 : vector<4x256xi1>, vector<4x256xf32>
    %47 = vector.shape_cast %29 : vector<1x256xi1> to vector<1x256xi1>
    %48 = vector.broadcast %47 : vector<1x256xi1> to vector<4x256xi1>
    %49 = arith.select %48, %19, %21 : vector<4x256xi1>, vector<4x256xf32>
    %50 = vector.shape_cast %23 : vector<1x256xi1> to vector<1x256xi1>
    %51 = vector.broadcast %50 : vector<1x256xi1> to vector<4x256xi1>
    %52 = arith.select %51, %49, %46 : vector<4x256xi1>, vector<4x256xf32>
    %53 = arith.truncf %52 : vector<4x256xf32> to vector<4x256xbf16>
    %54 = vector.shape_cast %27 : vector<1x256xi1> to vector<1x256xi1>
    %55 = vector.broadcast %54 : vector<1x256xi1> to vector<4x256xi1>
    %56 = arith.select %55, %18, %17 : vector<4x256xi1>, vector<4x256xf32>
    %57 = arith.truncf %56 : vector<4x256xf32> to vector<4x256xbf16>
    %58 = arith.truncf %10 : vector<4x256xf32> to vector<4x256xbf16>
    %59 = vector.shape_cast %29 : vector<1x256xi1> to vector<1x256xi1>
    %60 = vector.broadcast %59 : vector<1x256xi1> to vector<4x256xi1>
    %61 = arith.select %60, %17, %18 : vector<4x256xi1>, vector<4x256xf32>
    %62 = arith.truncf %61 : vector<4x256xf32> to vector<4x256xbf16>
    %63 = vector.shape_cast %27 : vector<1x256xi1> to vector<1x256xi1>
    %64 = vector.broadcast %63 : vector<1x256xi1> to vector<4x256xi1>
    %65 = arith.select %64, %21, %19 : vector<4x256xi1>, vector<4x256xf32>
    %66 = vector.shape_cast %27 : vector<1x256xi1> to vector<1x256xi1>
    %67 = vector.broadcast %66 : vector<1x256xi1> to vector<4x256xi1>
    %68 = arith.select %67, %16, %14 : vector<4x256xi1>, vector<4x256xf32>
    %69 = vector.shape_cast %25 : vector<1x256xi1> to vector<1x256xi1>
    %70 = vector.broadcast %69 : vector<1x256xi1> to vector<4x256xi1>
    %71 = arith.select %70, %68, %65 : vector<4x256xi1>, vector<4x256xf32>
    %72 = arith.truncf %71 : vector<4x256xf32> to vector<4x256xbf16>
    %73 = vector.shape_cast %25 : vector<1x256xi1> to vector<1x256xi1>
    %74 = vector.broadcast %73 : vector<1x256xi1> to vector<4x256xi1>
    %75 = arith.select %74, %15, %20 : vector<4x256xi1>, vector<4x256xf32>
    %76 = arith.truncf %75 : vector<4x256xf32> to vector<4x256xbf16>
    %77 = vector.shape_cast %29 : vector<1x256xi1> to vector<1x256xi1>
    %78 = vector.broadcast %77 : vector<1x256xi1> to vector<4x256xi1>
    %79 = arith.select %78, %19, %21 : vector<4x256xi1>, vector<4x256xf32>
    %80 = vector.shape_cast %29 : vector<1x256xi1> to vector<1x256xi1>
    %81 = vector.broadcast %80 : vector<1x256xi1> to vector<4x256xi1>
    %82 = arith.select %81, %14, %16 : vector<4x256xi1>, vector<4x256xf32>
    %83 = vector.shape_cast %25 : vector<1x256xi1> to vector<1x256xi1>
    %84 = vector.broadcast %83 : vector<1x256xi1> to vector<4x256xi1>
    %85 = arith.select %84, %82, %79 : vector<4x256xi1>, vector<4x256xf32>
    %86 = arith.truncf %85 : vector<4x256xf32> to vector<4x256xbf16>
    %87 = tpu.concatenate %39, %43, %53, %57, %58, %62, %72, %76, %86 in 0 : vector<4x256xbf16>, vector<4x256xbf16>, vector<4x256xbf16>, vector<4x256xbf16>, vector<4x256xbf16>, vector<4x256xbf16>, vector<4x256xbf16>, vector<4x256xbf16>, vector<4x256xbf16> -> vector<36x256xbf16>
    %cst_16 = arith.constant dense<0.000000e+00> : vector<4x256xf32>
    %88 = tpu.matmul %11, %87, %cst_16 {dimension_numbers = #tpu.dot_dimension_numbers<[1], [0], [0], [1], [0, 0, 1, 1], [], []>} : vector<4x36xbf16>, vector<36x256xbf16>, vector<4x256xf32> -> vector<4x256xf32>
    %89 = arith.truncf %88 : vector<4x256xf32> to vector<4x256xbf16>
    %c0_17 = arith.constant 0 : index
    %c0_18 = arith.constant 0 : index
    %c0_19 = arith.constant 0 : index
    %90 = vector.load %arg7[%c0_17, %c0_18, %c0_19] : memref<1x4x256xbf16, #tpu.memory_space<vmem>>, vector<1x4x256xbf16>
    %91 = vector.shape_cast %90 : vector<1x4x256xbf16> to vector<4x256xbf16>
    %92 = vector.shape_cast %89 : vector<4x256xbf16> to vector<1x4x256xbf16>
    tpu.vector_store %arg7[%c0_17, %c0_18, %c0_19], %92 {strides = array<i32>} : memref<1x4x256xbf16, #tpu.memory_space<vmem>>, vector<1x4x256xbf16>,
    %cst_20 = arith.constant dense<0.000000e+00> : vector<4xf32>
    %93 = vector.multi_reduction <add>, %88, %cst_20 [1] : vector<4x256xf32> to vector<4xf32>
    %94 = vector.shape_cast %93 : vector<4xf32> to vector<4x1xf32>
    %95 = arith.mulf %88, %88 : vector<4x256xf32>
    %cst_21 = arith.constant dense<0.000000e+00> : vector<4xf32>
    %96 = vector.multi_reduction <add>, %95, %cst_21 [1] : vector<4x256xf32> to vector<4xf32>
    %97 = vector.shape_cast %96 : vector<4xf32> to vector<4x1xf32>
    %98 = tpu.concatenate %94, %97 in 1 : vector<4x1xf32>, vector<4x1xf32> -> vector<4x2xf32>
    %c0_22 = arith.constant 0 : index
    %c0_23 = arith.constant 0 : index
    %c0_24 = arith.constant 0 : index
    %99 = vector.load %arg8[%c0_22, %c0_23, %c0_24] : memref<1x4x2xf32, #tpu.memory_space<vmem>>, vector<1x4x2xf32>
    %100 = vector.shape_cast %99 : vector<1x4x2xf32> to vector<4x2xf32>
    %101 = vector.shape_cast %98 : vector<4x2xf32> to vector<1x4x2xf32>
    tpu.vector_store %arg8[%c0_22, %c0_23, %c0_24], %101 {strides = array<i32>} : memref<1x4x2xf32, #tpu.memory_space<vmem>>, vector<1x4x2xf32>,
    return
  }
  func.func @transform_0(%arg0: i32) -> (i32, i32, i32) {
    %c0_i32 = arith.constant 0 : i32
    %c0_i32_0 = arith.constant 0 : i32
    %c0_i32_1 = arith.constant 0 : i32
    return %arg0, %c0_i32, %c0_i32_0 : i32, i32, i32
  }
  func.func @transform_1(%arg0: i32) -> (i32, i32) {
    %c0_i32 = arith.constant 0 : i32
    %c0_i32_0 = arith.constant 0 : i32
    %c0_i32_1 = arith.constant 0 : i32
    return %c0_i32, %c0_i32_0 : i32, i32
  }
  func.func @transform_2(%arg0: i32) -> (i32, i32) {
    %c0_i32 = arith.constant 0 : i32
    %c0_i32_0 = arith.constant 0 : i32
    %c0_i32_1 = arith.constant 0 : i32
    return %c0_i32, %c0_i32_0 : i32, i32
  }
  func.func @transform_3(%arg0: i32) -> (i32, i32) {
    %c0_i32 = arith.constant 0 : i32
    %c0_i32_0 = arith.constant 0 : i32
    %c0_i32_1 = arith.constant 0 : i32
    return %c0_i32, %c0_i32_0 : i32, i32
  }
  func.func @transform_4(%arg0: i32) -> (i32, i32) {
    %c0_i32 = arith.constant 0 : i32
    %c0_i32_0 = arith.constant 0 : i32
    %c0_i32_1 = arith.constant 0 : i32
    return %c0_i32, %c0_i32_0 : i32, i32
  }
  func.func @transform_5(%arg0: i32) -> (i32, i32) {
    %c0_i32 = arith.constant 0 : i32
    %c0_i32_0 = arith.constant 0 : i32
    %c0_i32_1 = arith.constant 0 : i32
    return %c0_i32, %c0_i32_0 : i32, i32
  }
  func.func @transform_6(%arg0: i32) -> (i32, i32, i32) {
    %c0_i32 = arith.constant 0 : i32
    %c0_i32_0 = arith.constant 0 : i32
    %c0_i32_1 = arith.constant 0 : i32
    return %arg0, %c0_i32, %c0_i32_0 : i32, i32, i32
  }
  func.func @transform_7(%arg0: i32) -> (i32, i32, i32) {
    %c0_i32 = arith.constant 0 : i32
    %c0_i32_0 = arith.constant 0 : i32
    %c0_i32_1 = arith.constant 0 : i32
    return %arg0, %c0_i32, %c0_i32_0 : i32, i32, i32
  }
}

</mosaic_0001>

<bundles_post_ra>
// kernel: residual_block_batchnorm.5
= control target key start
LH: loop header
LB: loop body
LE: loop exit
PB: predicated region body
PF: predicated region fallthrough
CT: control target
= control target key end

     0   :  { %s380_s15 = smov 0   ;;  %s406_s0 = inlined_call_operand.vmem [shape: bf16[2,4,256], index: 0, kind: input, shape index: {}]   ;;  %s407_s1 = inlined_call_operand.vmem [shape: f32[2,4,256], index: 1, kind: input, shape index: {}]   ;;  %s408_s2 = inlined_call_operand.vmem [shape: f32[4,1], index: 2, kind: input, shape index: {}]   ;;  %s409_s3 = inlined_call_operand.vmem [shape: f32[4,1], index: 3, kind: input, shape index: {}]   ;;  %s410_s4 = inlined_call_operand.vmem [shape: f32[2,4,256], index: 4, kind: output, shape index: {}]  }
   0x1 LB: > { %s318_s16 = sadd.s32 4294967295, %s351_s15   ;;  %p322_p0 = scmp.ge.s32.totalorder %s351_s15, 1  ;;  %s351_s15 = sphi %s380_s15, %s14_s15  }
   0x2   : > { %p172_p1 = scmp.lt.s32.totalorder %s351_s15, 3 }
   0x4   : > { %p173_p2 = pnand %p322_p0, %p172_p1 }
   0x5   : > { %p203_p3 = scmp.lt.s32.totalorder (!%p173_p2), %s318_s16, 1 }
   0x6   : > { %176 = sbr.rel (%p173_p2) target bundleno = 148 (0x94), region = 36 }
   0xb   : > { %v220_v0 = vld [vmem:[%s408_s2] sm:$0xf]  ;;  %v353_v1 = vmov 0   ;;  %s412_s16 = smov (!%p203_p3, %s318_s16), 1  ;;  %v354_v3 = vmov 839922192   ;;  %v228_v5 = vlaneseq }
   0xc   : > { %344 = vset.pattern.permute.xlu0 %v353_v1  ;;  %v234_v2 = vld [vmem:[%s409_s3] sm:$0xf]  ;;  %v226_v4 = vunpack.c.l.s4 %v354_v3  ;;  %s331_s21 = sshll.u32 %s412_s16, 2  ;;  %s332_s25 = sshll.u32 %s412_s16, 3 }
   0xd   : > { %223 = vperm.xlu0 %344, %v220_v0   ;;  %v229_v7 = vshrl.u32 %v228_v5, 7  ;;  %s207_s24 = scalar_lea.vmem %s406_s0, %s331_s21  ;;  %s212_s28 = scalar_lea.vmem %s407_s1, %s332_s25 }
   0xe   : > { %v227_v6 = vunpack.c.0.s8 %v226_v4  ;;  %v218_v9 = vld [vmem:[%s207_s24] sm:$0xf]  ;;  %s217_s5 = scalar_lea.vmem %s410_s4, %s332_s25 }
   0xf   : > { %v219_v11 = vunpack.c.l.bf16 %v218_v9  ;;  %v248_v16 = vld [vmem:[%s212_s28] sm:$0xff] }
  0x10   : > { %v230_v8 = vsub.s32 %v227_v6, %v229_v7 }
  0x11   : > { %237 = vperm.xlu0 %344, %v234_v2  }
  0x88   : > { %v224_v10 = vpop.permute.xlu0 %223 }
  0x89   : > { %v231_v12 = vrot.slane %v224_v10, %v230_v8 }
  0x8b   : > { %v233_v14 = vmul.f32 %v231_v12, %v219_v11 }
  0x8c   : > { %v238_v13 = vpop.permute.xlu0 %237 }
  0x8d   : > { %v245_v15 = vrot.slane %v238_v13, %v230_v8 }
  0x8f   : > { %v247_v17 = vadd.f32 %v245_v15, %v233_v14 }
  0x91   : > { %v249_v18 = vadd.f32 %v248_v16, %v247_v17 }
  0x93   : > { %250 = vst [vmem:[%s217_s5] sm:$0xff] %v249_v18 }
  0x94 PF: > { %s14_s15 = sadd.s32 1, %s351_s15  }
  0x95   : > { %p11_p4 = scmp.ge.s32.totalorder %s14_s15, 4  }
  0x97   :  { %13 = sbr.rel (!%p11_p4) target bundleno = 1 (0x1), region = 69 }

// kernel: residual_block_batchnorm.3
= control target key start
LH: loop header
LB: loop body
LE: loop exit
PB: predicated region body
PF: predicated region fallthrough
CT: control target
= control target key end

     0   :  { %s741_s18 = smov 0   ;;  %s944_s0 = inlined_call_operand.vmem [shape: f32[2,4,256], index: 0, kind: input, shape index: {}]   ;;  %s945_s1 = inlined_call_operand.vmem [shape: bf16[4,36], index: 1, kind: input, shape index: {}]   ;;  %s946_s2 = inlined_call_operand.vmem [shape: f32[1,256], index: 2, kind: input, shape index: {}]   ;;  %s947_s3 = inlined_call_operand.vmem [shape: f32[1,256], index: 3, kind: input, shape index: {}]   ;;  %s948_s4 = inlined_call_operand.vmem [shape: bf16[2,4,256], index: 4, kind: output, shape index: {0}]   ;;  %s949_s5 = inlined_call_operand.vmem [shape: f32[2,4,2], index: 5, kind: output, shape index: {1}]  }
   0x1 LB: > { %s618_s19 = sadd.s32 4294967295, %s700_s18   ;;  %p622_p0 = scmp.ge.s32.totalorder %s700_s18, 1  ;;  %s700_s18 = sphi %s741_s18, %s16_s18  }
   0x2   : > { %p190_p1 = scmp.lt.s32.totalorder %s700_s18, 3 }
   0x4   : > { %p191_p2 = pnand %p622_p0, %p190_p1 }
   0x5   : > { %p222_p3 = scmp.lt.s32.totalorder (!%p191_p2), %s618_s19, 1  ;;  %s703_s24 = smov (!%p191_p2), 1  }
   0x6   : > { %194 = sbr.rel (%p191_p2) target bundleno = 507 (0x1fb), region = 36  ;;  %s704_s25 = smov (!%p191_p2), 17  }
   0x7   : > { %s705_s26 = smov (!%p191_p2), 127   ;;  %s706_s27 = smov (!%p191_p2), 15  }
   0x8   : > { %s707_s28 = smov (!%p191_p2), 111   ;;  %s708_s29 = smov (!%p191_p2), 113  }
   0x9   : > { %s709_s30 = smov (!%p191_p2), 112   ;;  %s710_s6 = smov (!%p191_p2), 16  }
   0xb   : > { %v702_v0 = vmov 0   ;;  %s967_s19 = smov (!%p222_p3, %s618_s19), 1  ;;  %v248_v4 = vlaneseq  ;;  %v240_v5 = vld [vmem:[%s947_s3] sm:$0x3] }
   0xc   : > { %493 = vmatprep.mubr.bf16.mxu0 %v702_v0  ;;  %s634_s20 = sshll.u32 %s967_s19, 3  ;;  %vm304_vm0 = vcmp.eq.f32.partialorder %v240_v5, 0.0  ;;  %v239_v7 = vld [vmem:[%s946_s2] sm:$0x3]  ;;  %vm305_vm1 = vcmp.eq.f32.partialorder %v240_v5, 15.0  ;;  %s635_s13 = sshll.u32 %s967_s19, 2 }
   0xd   : > { %s226_s23 = scalar_lea.vmem %s944_s0, %s634_s20  ;;  %v308_v6 = vshrl.u32 %v248_v4, 7  ;;  %v306_v10 = vsel %vm304_vm0, 1, %v702_v0  ;;  %v769_v11 = vand.u32 127, %v248_v4  ;;  %vm303_vm2 = vcmp.eq.f32.partialorder %v239_v7, 15.0  ;;  %s231_s16 = scalar_lea.vmem %s948_s4, %s635_s13 }
   0xe   : > { %v755_v1 = vld [vmem:[%s226_s23] sm:$0xff]  ;;  %v340_v12 = vsel %vm305_vm1, 1, %v702_v0  ;;  %vm302_vm3 = vcmp.eq.f32.partialorder %v239_v7, 0.0  ;;  %v369_v16 = vsel %vm303_vm2, 1, %v702_v0  ;;  %s235_s20 = scalar_lea.vmem %s949_s5, %s635_s13 }
   0xf   : > { %v759_v2 = vcombine.high %v755_v1, %v755_v1  ;;  %v309_v8 = vsub.s32 0, %v308_v6  ;;  %v313_v9 = vsub.s32 1, %v308_v6  ;;  %vm271_vm4 = vcmp.lt.s32.totalorder %v769_v11, 1 }
  0x10   : > { %vm250_vm5 = vcmp.lt.s32.totalorder %v769_v11, 17  ;;  %v321_v19 = vsel %vm302_vm3, 1, %v702_v0  ;;  %vm278_vm6 = vcmp.lt.s32.totalorder %v769_v11, 127  ;;  %vm264_vm7 = vcmp.lt.s32.totalorder %v769_v11, 15 }
  0x11   : > { %v663_v3 = vpack.i.bf16 %v759_v2, %v755_v1  ;;  %v310_v13 = vrot.slane %v306_v10, %v309_v8  ;;  %v314_v14 = vrot.slane %v306_v10, %v313_v9  ;;  %v348_v15 = vrot.slane %v340_v12, %v313_v9 }
  0x12   : > { %v344_v20 = vrot.slane %v340_v12, %v309_v8  ;;  %vm299_vm8 = vcmp.lt.s32.totalorder %v769_v11, 111  ;;  %vm285_vm9 = vcmp.lt.s32.totalorder %v769_v11, 113  ;;  %v377_v23 = vrot.slane %v369_v16, %v313_v9 }
  0x13   : > { %664 = vrot.lane.b32.xlu1 %v663_v3, %s703_s24  ;;  %654 = vrot.lane.b32.xlu0 %v663_v3, %s704_s25  ;;  %vm777_vm10 = vcmp.eq.s32.totalorder %v310_v13, 1  ;;  %vm781_vm11 = vcmp.eq.s32.totalorder %v314_v14, 1  ;;  %v373_v24 = vrot.slane %v369_v16, %v309_v8  ;;  %v329_v27 = vrot.slane %v321_v19, %v313_v9 }
  0x14   : > { %vm785_vm12 = vcmp.eq.s32.totalorder %v348_v15, 1  ;;  %vm292_vm13 = vcmp.lt.s32.totalorder %v769_v11, 112  ;;  %vm257_vm14 = vcmp.lt.s32.totalorder %v769_v11, 16  ;;  %v325_v33 = vrot.slane %v321_v19, %v309_v8 }
  0x15   : > { %vm791_vm15 = vcmp.eq.s32.totalorder %v344_v20, 1  ;;  %vm795_vm0 = vcmp.eq.s32.totalorder %v377_v23, 1  ;;  %vm799_vm1 = vcmp.eq.s32.totalorder %v373_v24, 1  ;;  %v364_v41 = vpack.c.bf16 %v759_v2, %v759_v2 }
  0x16   : > { %v363_v42 = vpack.c.bf16 %v755_v1, %v755_v1  ;;  %vm815_vm2 = vcmp.eq.s32.totalorder %v329_v27, 1  ;;  %vm829_vm3 = vcmp.eq.s32.totalorder %v325_v33, 1 }
  0x17   : > { %669 = vrot.lane.b32.xlu1 %v663_v3, %s705_s26  ;;  %659 = vrot.lane.b32.xlu0 %v663_v3, %s706_s27 }
  0x1b   : > { %679 = vrot.lane.b32.xlu1 %v663_v3, %s707_s28  ;;  %674 = vrot.lane.b32.xlu0 %v663_v3, %s708_s29 }
  0x1f   : > { %689 = vrot.lane.b32.xlu1 %v663_v3, %s709_s30  ;;  %684 = vrot.lane.b32.xlu0 %v663_v3, %s710_s6 }
  0x85   : > { %v665_v17 = vpop.permute.xlu1 %664  ;;  %v655_v18 = vpop.permute.xlu0 %654 }
  0x86   : > { %v667_v25 = vunpack.i.h.bf16 %v665_v17  ;;  %v666_v26 = vunpack.i.l.bf16 %v665_v17  ;;  %v657_v29 = vunpack.i.h.bf16 %v655_v18  ;;  %v656_v30 = vunpack.i.l.bf16 %v655_v18 }
  0x88   : > { %v272_v43 = vsel %vm271_vm4, %v666_v26, %v667_v25  ;;  %v821_v48 = vsel %vm271_vm4, %v667_v25, %v666_v26  ;;  %v252_v49 = vsel %vm250_vm5, %v657_v29, %v656_v30  ;;  %v251_v52 = vsel %vm250_vm5, %v656_v30, %v657_v29 }
  0x89   : > { %v670_v31 = vpop.permute.xlu1 %669  ;;  %v660_v32 = vpop.permute.xlu0 %659  ;;  %vm416_vm4 = vcmask 1041408   ;;  %vm423_vm5 = vcmask 1043456  }
  0x8a   : > { %v672_v35 = vunpack.i.h.bf16 %v670_v31  ;;  %v671_v36 = vunpack.i.l.bf16 %v670_v31  ;;  %v662_v37 = vunpack.i.h.bf16 %v660_v32  ;;  %v661_v38 = vunpack.i.l.bf16 %v660_v32 }
  0x8c   : > { %v280_v44 = vsel %vm278_vm6, %v672_v35, %v671_v36  ;;  %v266_v45 = vsel %vm264_vm7, %v662_v37, %v661_v38  ;;  %v265_v46 = vsel %vm264_vm7, %v661_v38, %v662_v37  ;;  %v835_v59 = vsel %vm278_vm6, %v671_v36, %v672_v35 }
  0x8d   : > { %v680_v50 = vpop.permute.xlu1 %679  ;;  %v675_v51 = vpop.permute.xlu0 %674  ;;  %v366_v53 = vsel %vm785_vm12, %v272_v43, %v280_v44  ;;  %v839_v60 = vsel %vm777_vm10, %v266_v45, %v252_v49  ;;  %v318_v61 = vsel %vm781_vm11, %v265_v46, %v251_v52  ;;  %vm428_vm6 = vcmask 1045504  }
  0x8e   : > { %v682_v55 = vunpack.i.h.bf16 %v680_v50  ;;  %v681_v56 = vunpack.i.l.bf16 %v680_v50  ;;  %v677_v57 = vunpack.i.h.bf16 %v675_v51  ;;  %v676_v58 = vunpack.i.l.bf16 %v675_v51 }
  0x8f   : > { %v368_v62 = vpack.c.bf16 %v366_v53, %v366_v53  ;;  %v352_v8 = vsel %vm785_vm12, %v251_v52, %v265_v46  ;;  %v351_v10 = vsel %vm791_vm15, %v252_v49, %v266_v45  ;;  %v365_v19 = vsel %vm791_vm15, %v821_v48, %v835_v59 }
  0x90   : > { %v300_v63 = vsel %vm299_vm8, %v681_v56, %v682_v55  ;;  %v286_v0 = vsel %vm285_vm9, %v676_v58, %v677_v57  ;;  %v287_v3 = vsel %vm285_vm9, %v677_v57, %v676_v58  ;;  %v301_v4 = vsel %vm299_vm8, %v682_v55, %v681_v56 }
  0x91   : > { %v690_v5 = vpop.permute.xlu1 %689  ;;  %v685_v6 = vpop.permute.xlu0 %684  ;;  %v320_v7 = vsel %vm781_vm11, %v301_v4, %v287_v3  ;;  %v354_v9 = vsel %vm785_vm12, %v287_v3, %v301_v4  ;;  %v319_v16 = vsel %vm777_vm10, %v300_v63, %v286_v0  ;;  %v407_v25 = vrot.slane %v368_v62, 6 }
  0x92   : > { %v692_v12 = vunpack.i.h.bf16 %v690_v5  ;;  %v691_v13 = vunpack.i.l.bf16 %v690_v5  ;;  %v687_v14 = vunpack.i.h.bf16 %v685_v6  ;;  %v686_v15 = vunpack.i.l.bf16 %v685_v6 }
  0x93   : > { %v381_v17 = vsel %vm795_vm0, %v318_v61, %v320_v7  ;;  %v389_v18 = vsel %vm795_vm0, %v352_v8, %v354_v9  ;;  %v353_v31 = vsel %vm791_vm15, %v286_v0, %v300_v63  ;;  %v367_v32 = vpack.c.bf16 %v365_v19, %v365_v19 }
  0x94   : > { %v293_v20 = vsel %vm292_vm13, %v691_v13, %v692_v12  ;;  %v294_v23 = vsel %vm292_vm13, %v692_v12, %v691_v13  ;;  %v258_v24 = vsel %vm257_vm14, %v686_v15, %v687_v14  ;;  %v259_v26 = vsel %vm257_vm14, %v687_v14, %v686_v15  ;;  %v238_v13 = vld [vmem:[%s945_s1] sm:$0x3] }
  0x95   : > { %v383_v27 = vpack.c.bf16 %v381_v17, %v381_v17  ;;  %v385_v28 = vsel %vm795_vm0, %v258_v24, %v294_v23  ;;  %v391_v29 = vpack.c.bf16 %v389_v18, %v389_v18  ;;  %v380_v33 = vsel %vm799_vm1, %v839_v60, %v319_v16 }
  0x96   : > { %v387_v30 = vpack.c.bf16 %v385_v28, %v385_v28  ;;  %v356_v35 = vsel %vm815_vm2, %v354_v9, %v352_v8  ;;  %v382_v11 = vpack.c.bf16 %v380_v33, %v380_v33  ;;  %v360_v37 = vsel %vm781_vm11, %v280_v44, %v272_v43 }
  0x97   : > { %v411_v36 = vrot.slane %v383_v27, 4  ;;  %628 = vmatprep.subr.msk.bf16.mxu0 %vm416_vm4, %v391_v29  ;;  %v355_v38 = vsel %vm829_vm3, %v353_v31, %v351_v10  ;;  %v388_v34 = vsel %vm799_vm1, %v351_v10, %v353_v31  ;;  %v406_v39 = vrot.slane %v367_v32, 6 }
  0x98   : > { %v415_v45 = vrot.slane %v387_v30, 2  ;;  %v390_v46 = vpack.c.bf16 %v388_v34, %v388_v34  ;;  %v410_v49 = vrot.slane %v382_v11, 4  ;;  %v440_v50 = vsel %vm416_vm4, %v364_v41, %v407_v25 }
  0x99   : > { %v384_v51 = vsel %vm799_vm1, %v259_v26, %v293_v20  ;;  %v333_v22 = vsel %vm815_vm2, %v320_v7, %v318_v61  ;;  %v444_v43 = vsel %vm423_vm5, %v440_v50, %v411_v36  ;;  %v437_v52 = vsel %vm416_vm4, %v363_v42, %v406_v39 }
  0x9a   : > { %v386_v44 = vpack.c.bf16 %v384_v51, %v384_v51  ;;  %v358_v53 = vpack.c.bf16 %v356_v35, %v356_v35  ;;  %v456_v55 = vsel %vm416_vm4, %v390_v46, 0  ;;  %v449_v2 = vsel %vm428_vm6, %v444_v43, %v415_v45 }
  0x9b   : > { %v442_v41 = vsel %vm423_vm5, %v437_v52, %v410_v49  ;;  %v357_v40 = vpack.c.bf16 %v355_v38, %v355_v38  ;;  %472 = vmatpush1.bf16.msra.mxu0 %v456_v55  ;;  %v337_v57 = vsel %vm815_vm2, %v294_v23, %v258_v24  ;;  %v362_v58 = vpack.c.bf16 %v360_v37, %v360_v37 }
  0x9c   : > { %v414_v56 = vrot.slane %v386_v44, 2  ;;  %473 = vmatprep.subr.bf16.mxu0 %v449_v2  ;;  %v339_v61 = vpack.c.bf16 %v337_v57, %v337_v57  ;;  %v332_v1 = vsel %vm829_vm3, %v319_v16, %v839_v60  ;;  %v336_v42 = vsel %vm829_vm3, %v293_v20, %v259_v26 }
  0x9d   : > { %v359_v62 = vsel %vm777_vm10, %v835_v59, %v821_v48  ;;  %v338_v0 = vpack.c.bf16 %v336_v42, %v336_v42  ;;  %v335_v3 = vpack.c.bf16 %v333_v22, %v333_v22  ;;  %v399_v5 = vrot.slane %v358_v53, 4 }
  0x9e   : > { %v446_v63 = vsel %vm428_vm6, %v442_v41, %v414_v56  ;;  %v361_v47 = vpack.c.bf16 %v359_v62, %v359_v62  ;;  %v395_v4 = vrot.slane %v339_v61, 6  ;;  %v334_v6 = vpack.c.bf16 %v332_v1, %v332_v1 }
  0x9f   : > { %474 = vmatpush1.bf16.msra.mxu0 %v446_v63  ;;  %v394_v7 = vrot.slane %v338_v0, 6  ;;  %v398_v60 = vrot.slane %v357_v40, 4  ;;  %v403_v8 = vrot.slane %v362_v58, 2  ;;  %vm451_vm7 = vcmask 293888  }
  0xa0   : > { %v422_v54 = vsel %vm416_vm4, %v335_v3, %v395_v4  ;;  %v402_v10 = vrot.slane %v361_v47, 2  ;;  %vm528_vm8 = vcmask 7168   ;;  %vm530_vm9 = vcmask 11264  }
  0xa1   : > { %v427_v9 = vsel %vm423_vm5, %v422_v54, %v399_v5  ;;  %v419_v21 = vsel %vm416_vm4, %v334_v6, %v394_v7 }
  0xa2   : > { %v433_v48 = vsel %vm428_vm6, %v427_v9, %v403_v8  ;;  %v425_v59 = vsel %vm423_vm5, %v419_v21, %v398_v60 }
  0xa3   : > { %475 = vmatprep.subr.bf16.mxu0 %v433_v48  ;;  %v430_v12 = vsel %vm428_vm6, %v425_v59, %v402_v10 }
  0xa4   : > { %476 = vmatpush1.bf16.msra.mxu0 %v430_v12 }
  0xa7   : > { %629 = vmatmul.mubr.msk.bf16.vlgmr.msra.gmra.mxu0 %vm451_vm7, %v238_v13 }
 0x167   : > { %v495_v14 = vpop.f32.mrf.mxu0 }
 0x168   : > { %v521_v15 = vmul.f32 %v495_v14, %v495_v14  ;;  %v516_v19 = vsel %vm423_vm5, %v495_v14, 0.0 }
 0x169   : > { %v497_v16 = vpop.f32.mrf.mxu0 }
 0x16a   : > { %v630_v17 = vpack.c.bf16 %v497_v16, %v495_v14  ;;  %v522_v18 = vmul.f32 %v497_v16, %v497_v16  ;;  %v517_v20 = vsel %vm423_vm5, %v497_v16, 0.0  ;;  %v523_v25 = vsel %vm423_vm5, %v521_v15, 0.0 }
 0x16b   : > { %v499_v23 = vpop.f32.mrf.mxu0  ;;  %v518_v24 = vadd.f32 %v517_v20, %v516_v19 }
 0x16c   : > { %631 = vst.sshfl [vmem:[%s231_s16] sm:$0x33 pattern:$0x76325410] %v630_v17  ;;  %v524_v26 = vsel %vm423_vm5, %v522_v18, 0.0 }
 0x16d   : > { %519 = vadd.xlane.f32.xlu0 %v518_v24  ;;  %v500_v27 = vpop.f32.mrf.mxu0  ;;  %v525_v28 = vadd.f32 %v524_v26, %v523_v25 }
 0x16f   : > { %526 = vadd.xlane.f32.xlu1 %v525_v28 }
 0x1f6   : > { %v520_v29 = vpop.xlane.xlu0 %519 }
 0x1f8   : > { %v527_v30 = vpop.xlane.xlu1 %526 }
 0x1f9   : > { %v529_v31 = vsel %vm528_vm8, %v520_v29, %v527_v30 }
 0x1fa   : > { %531 = vst.msk [vmem:[%s235_s20] sm:$0xf] %vm530_vm9, %v529_v31 }
 0x1fb PF: > { %s16_s18 = sadd.s32 1, %s700_s18  }
 0x1fc   : > { %p13_p4 = scmp.ge.s32.totalorder %s16_s18, 4  }
 0x1fe   :  { %15 = sbr.rel (!%p13_p4) target bundleno = 1 (0x1), region = 78 }

// kernel: residual_block_batchnorm.4
= control target key start
LH: loop header
LB: loop body
LE: loop exit
PB: predicated region body
PF: predicated region fallthrough
CT: control target
= control target key end

     0   :  { %s837_s24 = smov 0   ;;  %s1059_s0 = inlined_call_operand.vmem [shape: bf16[2,4,256], index: 0, kind: input, shape index: {}]   ;;  %s1060_s1 = inlined_call_operand.vmem [shape: f32[4,1], index: 1, kind: input, shape index: {}]   ;;  %s1061_s2 = inlined_call_operand.vmem [shape: f32[4,1], index: 2, kind: input, shape index: {}]   ;;  %s1062_s3 = inlined_call_operand.vmem [shape: bf16[4,36], index: 3, kind: input, shape index: {}]   ;;  %s1063_s4 = inlined_call_operand.vmem [shape: f32[1,256], index: 4, kind: input, shape index: {}]   ;;  %s1064_s5 = inlined_call_operand.vmem [shape: f32[1,256], index: 5, kind: input, shape index: {}]   ;;  %s1065_s6 = inlined_call_operand.vmem [shape: bf16[2,4,256], index: 6, kind: output, shape index: {0}]   ;;  %s1066_s7 = inlined_call_operand.vmem [shape: f32[2,4,2], index: 7, kind: output, shape index: {1}]  }
   0x1 LB: > { %s702_s25 = sadd.s32 4294967295, %s785_s24   ;;  %p706_p0 = scmp.ge.s32.totalorder %s785_s24, 1  ;;  %s785_s24 = sphi %s837_s24, %s18_s24  }
   0x2   : > { %p240_p1 = scmp.lt.s32.totalorder %s785_s24, 3 }
   0x4   : > { %p241_p2 = pnand %p706_p0, %p240_p1 }
   0x5   : > { %p276_p3 = scmp.lt.s32.totalorder (!%p241_p2), %s702_s25, 1  ;;  %s789_s11 = smov (!%p241_p2), 1  }
   0x6   : > { %244 = sbr.rel (%p241_p2) target bundleno = 641 (0x281), region = 44  ;;  %s790_s12 = smov (!%p241_p2), 17  }
   0x7   : > { %s791_s13 = smov (!%p241_p2), 113   ;;  %s792_s14 = smov (!%p241_p2), 15  }
   0x8   : > { %s793_s15 = smov (!%p241_p2), 16   ;;  %s794_s16 = smov (!%p241_p2), 127  }
   0x9   : > { %s795_s17 = smov (!%p241_p2), 111   ;;  %s796_s18 = smov (!%p241_p2), 112  }
   0xb   : > { %v293_v0 = vld [vmem:[%s1060_s1] sm:$0xf]  ;;  %v787_v1 = vmov 0   ;;  %s1084_s25 = smov (!%p276_p3, %s702_s25), 1  ;;  %v788_v3 = vmov 839922192   ;;  %v301_v5 = vlaneseq }
   0xc   : > { %738 = vset.pattern.permute.xlu0 %v787_v1  ;;  %577 = vmatprep.mubr.bf16.mxu0 %v787_v1  ;;  %v307_v2 = vld [vmem:[%s1061_s2] sm:$0xf]  ;;  %v299_v4 = vunpack.c.l.s4 %v788_v3  ;;  %s853_s30 = sshll.u32 %s1084_s25, 2 }
   0xd   : > { %296 = vperm.xlu0 %738, %v293_v0   ;;  %v302_v7 = vshrl.u32 %v301_v5, 7  ;;  %s280_s10 = scalar_lea.vmem %s1059_s0, %s853_s30  ;;  %v324_v20 = vld [vmem:[%s1064_s5] sm:$0x3]  ;;  %v877_v26 = vand.u32 127, %v301_v5  ;;  %s285_s28 = scalar_lea.vmem %s1065_s6, %s853_s30 }
   0xe   : > { %v300_v6 = vunpack.c.0.s8 %v299_v4  ;;  %v291_v9 = vld [vmem:[%s280_s10] sm:$0xf]  ;;  %vm388_vm0 = vcmp.eq.f32.partialorder %v324_v20, 0.0  ;;  %vm389_vm1 = vcmp.eq.f32.partialorder %v324_v20, 15.0  ;;  %s289_s9 = scalar_lea.vmem %s1066_s7, %s853_s30 }
   0xf   : > { %v292_v11 = vunpack.c.l.bf16 %v291_v9  ;;  %v323_v21 = vld [vmem:[%s1063_s4] sm:$0x3]  ;;  %v873_v22 = vsub.s32 0, %v302_v7  ;;  %v397_v23 = vsub.s32 1, %v302_v7  ;;  %v390_v24 = vsel %vm388_vm0, 1, %v787_v1 }
  0x10   : > { %v303_v8 = vsub.s32 %v300_v6, %v302_v7  ;;  %vm386_vm2 = vcmp.eq.f32.partialorder %v323_v21, 0.0  ;;  %v424_v25 = vsel %vm389_vm1, 1, %v787_v1  ;;  %vm387_vm3 = vcmp.eq.f32.partialorder %v323_v21, 15.0 }
  0x11   : > { %310 = vperm.xlu0 %738, %v307_v2   ;;  %v394_v27 = vrot.slane %v390_v24, %v873_v22  ;;  %v398_v28 = vrot.slane %v390_v24, %v397_v23  ;;  %v405_v29 = vsel %vm386_vm2, 1, %v787_v1  ;;  %v432_v30 = vrot.slane %v424_v25, %v397_v23 }
  0x12   : > { %v428_v31 = vrot.slane %v424_v25, %v873_v22  ;;  %vm355_vm4 = vcmp.lt.s32.totalorder %v877_v26, 1  ;;  %vm334_vm5 = vcmp.lt.s32.totalorder %v877_v26, 17  ;;  %vm348_vm6 = vcmp.lt.s32.totalorder %v877_v26, 15 }
  0x13   : > { %vm885_vm7 = vcmp.eq.s32.totalorder %v394_v27, 1  ;;  %vm889_vm8 = vcmp.eq.s32.totalorder %v398_v28, 1  ;;  %v413_v36 = vrot.slane %v405_v29, %v397_v23  ;;  %v453_v37 = vsel %vm387_vm3, 1, %v787_v1 }
  0x14   : > { %vm369_vm9 = vcmp.lt.s32.totalorder %v877_v26, 113  ;;  %vm895_vm10 = vcmp.eq.s32.totalorder %v432_v30, 1  ;;  %vm899_vm11 = vcmp.eq.s32.totalorder %v428_v31, 1  ;;  %vm341_vm12 = vcmp.lt.s32.totalorder %v877_v26, 16 }
  0x15   : > { %vm362_vm13 = vcmp.lt.s32.totalorder %v877_v26, 127  ;;  %vm383_vm14 = vcmp.lt.s32.totalorder %v877_v26, 111  ;;  %v461_v48 = vrot.slane %v453_v37, %v397_v23  ;;  %v409_v49 = vrot.slane %v405_v29, %v873_v22 }
  0x16   : > { %vm911_vm15 = vcmp.eq.s32.totalorder %v413_v36, 1  ;;  %v457_v53 = vrot.slane %v453_v37, %v873_v22  ;;  %vm376_vm0 = vcmp.lt.s32.totalorder %v877_v26, 112  ;;  %vm500_vm3 = vcmask 1041408  }
  0x17   : > { %vm935_vm1 = vcmp.eq.s32.totalorder %v461_v48, 1  ;;  %vm939_vm2 = vcmp.eq.s32.totalorder %v409_v49, 1 }
  0x88   : > { %v297_v10 = vpop.permute.xlu0 %296 }
  0x89   : > { %v304_v12 = vrot.slane %v297_v10, %v303_v8 }
  0x8b   : > { %v306_v14 = vmul.f32 %v304_v12, %v292_v11 }
  0x8c   : > { %v311_v13 = vpop.permute.xlu0 %310 }
  0x8d   : > { %v318_v15 = vrot.slane %v311_v13, %v303_v8 }
  0x8f   : > { %v320_v16 = vadd.f32 %v318_v15, %v306_v14 }
  0x91   : > { %v859_v17 = vmax.f32 %v320_v16, 0.0 }
  0x93   : > { %v863_v18 = vcombine.high %v859_v17, %v859_v17  ;;  %v447_v45 = vpack.c.bf16 %v859_v17, %v859_v17 }
  0x95   : > { %v749_v19 = vpack.i.bf16 %v863_v18, %v859_v17  ;;  %v448_v44 = vpack.c.bf16 %v863_v18, %v863_v18 }
  0x97   : > { %750 = vrot.lane.b32.xlu0 %v749_v19, %s789_s11  ;;  %740 = vrot.lane.b32.xlu1 %v749_v19, %s790_s12 }
  0x9b   : > { %760 = vrot.lane.b32.xlu0 %v749_v19, %s791_s13  ;;  %745 = vrot.lane.b32.xlu1 %v749_v19, %s792_s14 }
  0x9f   : > { %770 = vrot.lane.b32.xlu0 %v749_v19, %s793_s15  ;;  %755 = vrot.lane.b32.xlu1 %v749_v19, %s794_s16 }
  0xa3   : > { %765 = vrot.lane.b32.xlu1 %v749_v19, %s795_s17 }
  0xa7   : > { %775 = vrot.lane.b32.xlu1 %v749_v19, %s796_s18 }
 0x109   : > { %v751_v32 = vpop.permute.xlu0 %750  ;;  %v741_v33 = vpop.permute.xlu1 %740 }
 0x10a   : > { %v743_v38 = vunpack.i.h.bf16 %v741_v33  ;;  %v742_v39 = vunpack.i.l.bf16 %v741_v33  ;;  %v753_v50 = vunpack.i.h.bf16 %v751_v32  ;;  %v752_v51 = vunpack.i.l.bf16 %v751_v32 }
 0x10c   : > { %v336_v54 = vsel %vm334_vm5, %v743_v38, %v742_v39  ;;  %v335_v56 = vsel %vm334_vm5, %v742_v39, %v743_v38  ;;  %v356_v4 = vsel %vm355_vm4, %v752_v51, %v753_v50  ;;  %v357_v5 = vsel %vm355_vm4, %v753_v50, %v752_v51 }
 0x10d   : > { %v761_v42 = vpop.permute.xlu0 %760  ;;  %v746_v43 = vpop.permute.xlu1 %745  ;;  %vm963_vm4 = vcmp.eq.s32.totalorder %v457_v53, 1  ;;  %vm507_vm5 = vcmask 1043456  }
 0x10e   : > { %v748_v46 = vunpack.i.h.bf16 %v746_v43  ;;  %v747_v47 = vunpack.i.l.bf16 %v746_v43  ;;  %v763_v6 = vunpack.i.h.bf16 %v761_v42  ;;  %v762_v7 = vunpack.i.l.bf16 %v761_v42 }
 0x110   : > { %v350_v55 = vsel %vm348_vm6, %v748_v46, %v747_v47  ;;  %v349_v57 = vsel %vm348_vm6, %v747_v47, %v748_v46  ;;  %v370_v22 = vsel %vm369_vm9, %v762_v7, %v763_v6  ;;  %v371_v23 = vsel %vm369_vm9, %v763_v6, %v762_v7 }
 0x111   : > { %v926_v58 = vsel %vm885_vm7, %v350_v55, %v336_v54  ;;  %v771_v59 = vpop.permute.xlu0 %770  ;;  %v756_v60 = vpop.permute.xlu1 %755  ;;  %v402_v61 = vsel %vm889_vm8, %v349_v57, %v335_v56  ;;  %v436_v62 = vsel %vm895_vm10, %v335_v56, %v349_v57  ;;  %v435_v63 = vsel %vm899_vm11, %v336_v54, %v350_v55 }
 0x112   : > { %v758_v0 = vunpack.i.h.bf16 %v756_v60  ;;  %v757_v1 = vunpack.i.l.bf16 %v756_v60  ;;  %v773_v8 = vunpack.i.h.bf16 %v771_v59  ;;  %v772_v9 = vunpack.i.l.bf16 %v771_v59 }
 0x113   : > { %vm512_vm6 = vcmask 1045504   ;;  %vm614_vm9 = vcmask 11264  }
 0x114   : > { %v363_v10 = vsel %vm362_vm13, %v757_v1, %v758_v0  ;;  %v364_v11 = vsel %vm362_vm13, %v758_v0, %v757_v1  ;;  %v342_v25 = vsel %vm341_vm12, %v772_v9, %v773_v8  ;;  %v343_v49 = vsel %vm341_vm12, %v773_v8, %v772_v9 }
 0x115   : > { %v766_v12 = vpop.permute.xlu1 %765  ;;  %v450_v13 = vsel %vm895_vm10, %v356_v4, %v364_v11  ;;  %v449_v14 = vsel %vm899_vm11, %v357_v5, %v363_v10  ;;  %v957_v15 = vsel %vm889_vm8, %v364_v11, %v356_v4  ;;  %v961_v16 = vsel %vm885_vm7, %v363_v10, %v357_v5 }
 0x116   : > { %v768_v19 = vunpack.i.h.bf16 %v766_v12  ;;  %v767_v20 = vunpack.i.l.bf16 %v766_v12  ;;  %v452_v24 = vpack.c.bf16 %v450_v13, %v450_v13  ;;  %v451_v29 = vpack.c.bf16 %v449_v14, %v449_v14 }
 0x118   : > { %v384_v27 = vsel %vm383_vm14, %v767_v20, %v768_v19  ;;  %v385_v28 = vsel %vm383_vm14, %v768_v19, %v767_v20  ;;  %v491_v43 = vrot.slane %v452_v24, 6  ;;  %v490_v53 = vrot.slane %v451_v29, 6 }
 0x119   : > { %v403_v30 = vsel %vm885_vm7, %v384_v27, %v370_v22  ;;  %v776_v31 = vpop.permute.xlu1 %775  ;;  %v404_v32 = vsel %vm889_vm8, %v385_v28, %v371_v23  ;;  %v438_v33 = vsel %vm895_vm10, %v371_v23, %v385_v28  ;;  %v437_v36 = vsel %vm899_vm11, %v370_v22, %v384_v27  ;;  %v322_v27 = vld [vmem:[%s1062_s3] sm:$0x3] }
 0x11a   : > { %v778_v37 = vunpack.i.h.bf16 %v776_v31  ;;  %v777_v38 = vunpack.i.l.bf16 %v776_v31  ;;  %v417_v39 = vsel %vm911_vm15, %v404_v32, %v402_v61  ;;  %v440_v42 = vsel %vm911_vm15, %v438_v33, %v436_v62 }
 0x11b   : > { %v465_v34 = vsel %vm935_vm1, %v402_v61, %v404_v32  ;;  %v473_v35 = vsel %vm935_vm1, %v436_v62, %v438_v33  ;;  %v439_v40 = vsel %vm939_vm2, %v437_v36, %v435_v63  ;;  %v464_v51 = vsel %vm963_vm4, %v926_v58, %v403_v30 }
 0x11c   : > { %v377_v41 = vsel %vm376_vm0, %v777_v38, %v778_v37  ;;  %v378_v46 = vsel %vm376_vm0, %v778_v37, %v777_v38  ;;  %v467_v47 = vpack.c.bf16 %v465_v34, %v465_v34  ;;  %v475_v48 = vpack.c.bf16 %v473_v35, %v473_v35 }
 0x11d   : > { %v469_v50 = vsel %vm935_vm1, %v342_v25, %v378_v46  ;;  %v466_v56 = vpack.c.bf16 %v464_v51, %v464_v51  ;;  %v472_v57 = vsel %vm963_vm4, %v435_v63, %v437_v36  ;;  %v524_v26 = vsel %vm500_vm3, %v448_v44, %v491_v43 }
 0x11e   : > { %v471_v54 = vpack.c.bf16 %v469_v50, %v469_v50  ;;  %v495_v55 = vrot.slane %v467_v47, 4  ;;  %712 = vmatprep.subr.msk.bf16.mxu0 %vm500_vm3, %v475_v48  ;;  %v474_v59 = vpack.c.bf16 %v472_v57, %v472_v57  ;;  %v468_v60 = vsel %vm963_vm4, %v343_v49, %v377_v41 }
 0x11f   : > { %v446_v61 = vpack.c.bf16 %v957_v15, %v957_v15  ;;  %v494_v62 = vrot.slane %v466_v56, 4  ;;  %v470_v2 = vpack.c.bf16 %v468_v60, %v468_v60  ;;  %v442_v4 = vpack.c.bf16 %v440_v42, %v440_v42 }
 0x120   : > { %v499_v0 = vrot.slane %v471_v54, 2  ;;  %v528_v1 = vsel %vm507_vm5, %v524_v26, %v495_v55  ;;  %v540_v63 = vsel %vm500_vm3, %v474_v59, 0  ;;  %v521_v18 = vsel %vm500_vm3, %v447_v45, %v490_v53 }
 0x121   : > { %v421_v44 = vsel %vm911_vm15, %v378_v46, %v342_v25  ;;  %556 = vmatpush1.bf16.msra.mxu0 %v540_v63  ;;  %v498_v6 = vrot.slane %v470_v2, 2  ;;  %v526_v7 = vsel %vm507_vm5, %v521_v18, %v494_v62  ;;  %v441_v9 = vpack.c.bf16 %v439_v40, %v439_v40 }
 0x122   : > { %v533_v5 = vsel %vm512_vm6, %v528_v1, %v499_v0  ;;  %v423_v8 = vpack.c.bf16 %v421_v44, %v421_v44  ;;  %v416_v10 = vsel %vm939_vm2, %v403_v30, %v926_v58  ;;  %v420_v17 = vsel %vm939_vm2, %v377_v41, %v343_v49 }
 0x123   : > { %557 = vmatprep.subr.bf16.mxu0 %v533_v5  ;;  %v445_v45 = vpack.c.bf16 %v961_v16, %v961_v16  ;;  %v530_v52 = vsel %vm512_vm6, %v526_v7, %v498_v6  ;;  %v419_v11 = vpack.c.bf16 %v417_v39, %v417_v39  ;;  %v422_v13 = vpack.c.bf16 %v420_v17, %v420_v17 }
 0x124   : > { %v479_v12 = vrot.slane %v423_v8, 6  ;;  %v483_v14 = vrot.slane %v442_v4, 4  ;;  %v487_v15 = vrot.slane %v446_v61, 2  ;;  %v418_v20 = vpack.c.bf16 %v416_v10, %v416_v10 }
 0x125   : > { %558 = vmatpush1.bf16.msra.mxu0 %v530_v52  ;;  %v478_v21 = vrot.slane %v422_v13, 6  ;;  %v482_v58 = vrot.slane %v441_v9, 4  ;;  %v486_v23 = vrot.slane %v445_v45, 2  ;;  %vm535_vm7 = vcmask 293888  }
 0x126   : > { %v506_v19 = vsel %vm500_vm3, %v419_v11, %v479_v12  ;;  %vm612_vm8 = vcmask 7168  }
 0x127   : > { %v511_v3 = vsel %vm507_vm5, %v506_v19, %v483_v14  ;;  %v503_v16 = vsel %vm500_vm3, %v418_v20, %v478_v21 }
 0x128   : > { %v517_v22 = vsel %vm512_vm6, %v511_v3, %v487_v15  ;;  %v509_v24 = vsel %vm507_vm5, %v503_v16, %v482_v58 }
 0x129   : > { %559 = vmatprep.subr.bf16.mxu0 %v517_v22  ;;  %v514_v25 = vsel %vm512_vm6, %v509_v24, %v486_v23 }
 0x12a   : > { %560 = vmatpush1.bf16.msra.mxu0 %v514_v25 }
 0x12d   : > { %713 = vmatmul.mubr.msk.bf16.vlgmr.msra.gmra.mxu0 %vm535_vm7, %v322_v27 }
 0x1ed   : > { %v579_v28 = vpop.f32.mrf.mxu0 }
 0x1ee   : > { %v605_v29 = vmul.f32 %v579_v28, %v579_v28  ;;  %v600_v33 = vsel %vm507_vm5, %v579_v28, 0.0 }
 0x1ef   : > { %v581_v30 = vpop.f32.mrf.mxu0 }
 0x1f0   : > { %v714_v31 = vpack.c.bf16 %v581_v30, %v579_v28  ;;  %v606_v32 = vmul.f32 %v581_v30, %v581_v30  ;;  %v601_v36 = vsel %vm507_vm5, %v581_v30, 0.0  ;;  %v607_v39 = vsel %vm507_vm5, %v605_v29, 0.0 }
 0x1f1   : > { %v583_v37 = vpop.f32.mrf.mxu0  ;;  %v602_v38 = vadd.f32 %v601_v36, %v600_v33 }
 0x1f2   : > { %715 = vst.sshfl [vmem:[%s285_s28] sm:$0x33 pattern:$0x76325410] %v714_v31  ;;  %v608_v42 = vsel %vm507_vm5, %v606_v32, 0.0 }
 0x1f3   : > { %603 = vadd.xlane.f32.xlu0 %v602_v38  ;;  %v584_v34 = vpop.f32.mrf.mxu0  ;;  %v609_v35 = vadd.f32 %v608_v42, %v607_v39 }
 0x1f5   : > { %610 = vadd.xlane.f32.xlu1 %v609_v35 }
 0x27c   : > { %v604_v43 = vpop.xlane.xlu0 %603 }
 0x27e   : > { %v611_v40 = vpop.xlane.xlu1 %610 }
 0x27f   : > { %v613_v41 = vsel %vm612_vm8, %v604_v43, %v611_v40 }
 0x280   : > { %615 = vst.msk [vmem:[%s289_s9] sm:$0xf] %vm614_vm9, %v613_v41 }
 0x281 PF: > { %s18_s24 = sadd.s32 1, %s785_s24  }
 0x282   : > { %p15_p4 = scmp.ge.s32.totalorder %s18_s24, 4  }
 0x284   :  { %17 = sbr.rel (!%p15_p4) target bundleno = 1 (0x1), region = 86 }

</bundles_post_ra>
